<compile_context>
chip_gen: v7x
topology: tpu7x:2x2x1
jax: 0.10.0
libtpu: 0.0.40
codegen_flags: <defaults>
</compile_context>

<pallas_src>
import jax
import jax.numpy as jnp
from jax.experimental import pallas as pl
from jax.experimental.pallas import tpu as pltpu

EPS = 1e-5           # nn.BatchNorm1d default eps
NEG_SLOPE = 0.01     # nn.LeakyReLU default negative_slope


def churn_kernel(x_ref, w1_ref, b1_ref, w3_ref, b3_ref, o_ref):
    # fc1 (eval-mode BatchNorm already folded into w1/b1 by the wrapper)
    h = jnp.dot(x_ref[...], w1_ref[...], preferred_element_type=jnp.float32)
    h = h + b1_ref[...]
    # LeakyReLU
    h = jnp.where(h > 0, h, NEG_SLOPE * h)
    # Dropout(p=0.3) -> identity in eval mode.
    # TODO(synk): training-mode dropout (pltpu.prng_random_bits mask) not implemented.
    # fc3 as VPU multiply + lane reduce (an N=1 MXU matmul would waste the MXU)
    y = jnp.sum(h * w3_ref[...], axis=-1)            # (TB,)
    o_ref[...] = y[None, :] + b3_ref[...]            # lane-dense (1, TB) store


def _round_up(n, m):
    return ((n + m - 1) // m) * m


def churn_forward(x, params, tb=1024):
    """x: [B, D] float32. params: dict of weights (see init_params)."""
    B, D = x.shape
    H = params["w1"].shape[1]   # 128

    # --- Fold eval-mode BatchNorm1d into fc1 (exact in eval mode) ---
    inv_std = jax.lax.rsqrt(params["var"] + EPS)                     # (1, H)
    scale = params["gamma"] * inv_std                                # (1, H)
    w1f = (params["w1"] * scale).astype(jnp.float32)                 # (D, H)
    b1f = ((params["b1"] - params["mean"]) * scale
           + params["beta"]).astype(jnp.float32)                     # (1, H)
    w3r = params["w3"].astype(jnp.float32)                           # (1, H)
    b3 = params["b3"].astype(jnp.float32)                            # (1, 1)

    # --- Batch tiling: lane-dense output blocks -> TB multiple of 128 ---
    TB = min(tb, _round_up(B, 128))
    nb = pl.cdiv(B, TB)
    B_pad = nb * TB
    x_p = x if B_pad == B else jnp.pad(x, ((0, B_pad - B), (0, 0)))

    # TODO(synk): no K-axis tiling over input_dim; (D, 128) fc1 weights must fit
    # VMEM (fine for typical churn-model input dims).
    out = pl.pallas_call(
        churn_kernel,
        out_shape=jax.ShapeDtypeStruct((1, B_pad), jnp.float32),
        grid=(nb,),
        in_specs=[
            pl.BlockSpec((TB, D), lambda i: (i, 0)),   # x tile, pipelined per step
            pl.BlockSpec((D, H), lambda i: (0, 0)),    # folded fc1 weight (resident)
            pl.BlockSpec((1, H), lambda i: (0, 0)),    # folded fc1 bias (resident)
            pl.BlockSpec((1, H), lambda i: (0, 0)),    # fc3 weight row (resident)
            pl.BlockSpec((1, 1), lambda i: (0, 0)),    # fc3 bias (resident)
        ],
        out_specs=pl.BlockSpec((1, TB), lambda i: (0, i)),
        compiler_params=pltpu.CompilerParams(
            dimension_semantics=("parallel",),
        ),
    )(x_p, w1f, b1f, w3r, b3)

    return out[0, :B].reshape(B, 1)


def init_params(key, input_dim, hidden=128):
    """Deterministic synthetic parameters matching ChurnModel's shapes."""
    k1, k2, k3, k4, k5 = jax.random.split(key, 5)
    # fc1: torch weight [128, input_dim] -> stored transposed [input_dim, 128]
    w1 = jax.random.normal(k1, (input_dim, hidden), jnp.float32) * 0.1
    b1 = jax.random.normal(k2, (1, hidden), jnp.float32) * 0.1
    # bn1 affine params + running stats (kept 2D [1, H] for lane layout)
    gamma = jnp.ones((1, hidden), jnp.float32) * 1.1
    beta = jnp.full((1, hidden), 0.05, jnp.float32)
    mean = jax.random.normal(k3, (1, hidden), jnp.float32) * 0.05
    var = jnp.abs(jax.random.normal(k4, (1, hidden), jnp.float32)) + 0.5
    # fc3: torch weight [1, 128] -> kept as a [1, 128] row
    w3 = jax.random.normal(k5, (1, hidden), jnp.float32) * 0.1
    b3 = jnp.full((1, 1), 0.02, jnp.float32)
    return dict(w1=w1, b1=b1, gamma=gamma, beta=beta, mean=mean, var=var,
                w3=w3, b3=b3)


def reference_forward(x, p):
    """Plain-JAX reference (unfolded, torch eval-mode semantics)."""
    h = x @ p["w1"] + p["b1"]
    h = (h - p["mean"]) * jax.lax.rsqrt(p["var"] + EPS) * p["gamma"] + p["beta"]
    h = jnp.where(h > 0, h, NEG_SLOPE * h)
    return h @ p["w3"].T + p["b3"]


if __name__ == "__main__":
    key = jax.random.PRNGKey(0)
    B, D = 8, 32
    kx, kp = jax.random.split(key)
    x = jax.random.normal(kx, (B, D), jnp.float32)
    params = init_params(kp, D)

    out = churn_forward(x, params)
    out = jax.block_until_ready(out)

    ref = reference_forward(x, params)
    assert out.shape == (B, 1)
    assert jnp.allclose(out, ref, atol=1e-4, rtol=1e-4)
    print("KERNEL_OK")
</pallas_src>

<mosaic_0001>
module attributes {stable_mosaic.version = 11 : i64} {
  func.func @churn_kernel(%arg0: i32, %arg1: memref<128x32xf32, #tpu.memory_space<vmem>>, %arg2: memref<32x128xf32, #tpu.memory_space<vmem>>, %arg3: memref<1x128xf32, #tpu.memory_space<vmem>>, %arg4: memref<1x128xf32, #tpu.memory_space<vmem>>, %arg5: memref<1x1xf32, #tpu.memory_space<vmem>>, %arg6: memref<1x128xf32, #tpu.memory_space<vmem>>) attributes {dimension_semantics = [#tpu.dimension_semantics<parallel>], iteration_bounds = array<i64: 1>, scalar_prefetch = 0 : i64, scratch_operands = 0 : i64, tpu.core_type = #tpu.core_type<tc>, window_params = [{transform_indices = @transform_0, window_bounds = array<i64: 128, 32>}, {pipeline_mode = #tpu.pipeline_mode<synchronous>, transform_indices = @transform_1, window_bounds = array<i64: 32, 128>}, {pipeline_mode = #tpu.pipeline_mode<synchronous>, transform_indices = @transform_2, window_bounds = array<i64: 1, 128>}, {pipeline_mode = #tpu.pipeline_mode<synchronous>, transform_indices = @transform_3, window_bounds = array<i64: 1, 128>}, {pipeline_mode = #tpu.pipeline_mode<synchronous>, transform_indices = @transform_4, window_bounds = array<i64: 1, 1>}, {transform_indices = @transform_5, window_bounds = array<i64: 1, 128>}]} {
    %c0 = arith.constant 0 : index
    %c0_0 = arith.constant 0 : index
    %0 = vector.load %arg1[%c0, %c0_0] : memref<128x32xf32, #tpu.memory_space<vmem>>, vector<128x32xf32>
    %c0_1 = arith.constant 0 : index
    %c0_2 = arith.constant 0 : index
    %1 = vector.load %arg2[%c0_1, %c0_2] : memref<32x128xf32, #tpu.memory_space<vmem>>, vector<32x128xf32>
    %cst = arith.constant dense<0.000000e+00> : vector<128x128xf32>
    %2 = tpu.matmul %0, %1, %cst {dimension_numbers = #tpu.dot_dimension_numbers<[1], [0], [0], [1], [0, 0, 1, 1], [], []>} : vector<128x32xf32>, vector<32x128xf32>, vector<128x128xf32> -> vector<128x128xf32>
    %c0_3 = arith.constant 0 : index
    %c0_4 = arith.constant 0 : index
    %3 = vector.load %arg3[%c0_3, %c0_4] : memref<1x128xf32, #tpu.memory_space<vmem>>, vector<1x128xf32>
    %4 = vector.broadcast %3 : vector<1x128xf32> to vector<128x128xf32>
    %5 = arith.addf %2, %4 : vector<128x128xf32>
    %cst_5 = arith.constant 0.000000e+00 : f32
    %6 = vector.broadcast %cst_5 : f32 to vector<128x128xf32>
    %7 = arith.cmpf ogt, %5, %6 : vector<128x128xf32>
    %cst_6 = arith.constant 0.00999999977 : f32
    %8 = vector.broadcast %cst_6 : f32 to vector<128x128xf32>
    %9 = arith.mulf %8, %5 : vector<128x128xf32>
    %10 = arith.select %7, %5, %9 : vector<128x128xi1>, vector<128x128xf32>
    %c0_7 = arith.constant 0 : index
    %c0_8 = arith.constant 0 : index
    %11 = vector.load %arg4[%c0_7, %c0_8] : memref<1x128xf32, #tpu.memory_space<vmem>>, vector<1x128xf32>
    %12 = vector.broadcast %11 : vector<1x128xf32> to vector<128x128xf32>
    %13 = arith.mulf %10, %12 : vector<128x128xf32>
    %cst_9 = arith.constant dense<0.000000e+00> : vector<128xf32>
    %14 = vector.multi_reduction <add>, %13, %cst_9 [1] : vector<128x128xf32> to vector<128xf32>
    %15 = vector.shape_cast %14 : vector<128xf32> to vector<1x128xf32>
    %c0_10 = arith.constant 0 : index
    %c0_11 = arith.constant 0 : index
    %16 = vector.load %arg5[%c0_10, %c0_11] : memref<1x1xf32, #tpu.memory_space<vmem>>, vector<1x1xf32>
    %17 = vector.broadcast %16 : vector<1x1xf32> to vector<1x128xf32>
    %18 = arith.addf %15, %17 : vector<1x128xf32>
    %c0_12 = arith.constant 0 : index
    %c0_13 = arith.constant 0 : index
    %19 = vector.load %arg6[%c0_12, %c0_13] : memref<1x128xf32, #tpu.memory_space<vmem>>, vector<1x128xf32>
    tpu.vector_store %arg6[%c0_12, %c0_13], %18 {strides = array<i32>} : memref<1x128xf32, #tpu.memory_space<vmem>>, vector<1x128xf32>,
    return
  }
  func.func @transform_0(%arg0: i32) -> (i32, i32) {
    %c0_i32 = arith.constant 0 : i32
    %c0_i32_0 = arith.constant 0 : i32
    return %arg0, %c0_i32 : i32, i32
  }
  func.func @transform_1(%arg0: i32) -> (i32, i32) {
    %c0_i32 = arith.constant 0 : i32
    %c0_i32_0 = arith.constant 0 : i32
    %c0_i32_1 = arith.constant 0 : i32
    return %c0_i32, %c0_i32_0 : i32, i32
  }
  func.func @transform_2(%arg0: i32) -> (i32, i32) {
    %c0_i32 = arith.constant 0 : i32
    %c0_i32_0 = arith.constant 0 : i32
    %c0_i32_1 = arith.constant 0 : i32
    return %c0_i32, %c0_i32_0 : i32, i32
  }
  func.func @transform_3(%arg0: i32) -> (i32, i32) {
    %c0_i32 = arith.constant 0 : i32
    %c0_i32_0 = arith.constant 0 : i32
    %c0_i32_1 = arith.constant 0 : i32
    return %c0_i32, %c0_i32_0 : i32, i32
  }
  func.func @transform_4(%arg0: i32) -> (i32, i32) {
    %c0_i32 = arith.constant 0 : i32
    %c0_i32_0 = arith.constant 0 : i32
    %c0_i32_1 = arith.constant 0 : i32
    return %c0_i32, %c0_i32_0 : i32, i32
  }
  func.func @transform_5(%arg0: i32) -> (i32, i32) {
    %c0_i32 = arith.constant 0 : i32
    %c0_i32_0 = arith.constant 0 : i32
    return %c0_i32, %arg0 : i32, i32
  }
}

</mosaic_0001>

<bundles_post_ra>
// kernel: tpu_custom_call.1
= control target key start
LH: loop header
LB: loop body
LE: loop exit
PB: predicated region body
PF: predicated region fallthrough
CT: control target
= control target key end

     0   :  { %s855_s0 = inlined_call_operand.vmem [shape: f32[128,32], index: 0, kind: input, shape index: {}]   ;;  %s856_s1 = inlined_call_operand.vmem [shape: f32[32,128], index: 1, kind: input, shape index: {}]   ;;  %s857_s2 = inlined_call_operand.vmem [shape: f32[1,128], index: 2, kind: input, shape index: {}]   ;;  %s858_s3 = inlined_call_operand.vmem [shape: f32[1,128], index: 3, kind: input, shape index: {}]   ;;  %s859_s4 = inlined_call_operand.<no memory space> [shape: f32[1,1], index: 4, kind: input, shape index: {}]   ;;  %s860_s5 = inlined_call_operand.hbm [shape: f32[1,128], index: 5, kind: output, shape index: {}]  }
   0x1   :  { %v10_v0 = vstv %s859_s4 }
   0x2   :  { %11 = vst [vmem:[#allocation2] sm:$0x1] %v10_v0 }
   0x3   :  { %v39_v1 = vld [vmem:[%s856_s1] sm:$0xff]  ;;  %v40_v2 = vld [vmem:[%s856_s1 + $0x8] sm:$0xff]  ;;  %v41_v3 = vld [vmem:[%s856_s1 + $0x10] sm:$0xff]  ;;  %vm50_vm0 = vcmask 261120  }
   0x4   :  { %v586_v4 = vpack.c.bf16 %v40_v2, %v39_v1  ;;  %v42_v5 = vld [vmem:[%s856_s1 + $0x18] sm:$0xff]  ;;  %v23_v6 = vld [vmem:[%s855_s0] sm:$0xff] }
   0x5   :  { %v590_v7 = vpack.c.bf16 %v42_v5, %v41_v3  ;;  %562 = vmatprep.mubr.msk.f32.mxu0 %vm50_vm0, %v23_v6  ;;  %v31_v8 = vld [vmem:[%s855_s0 + $0x40] sm:$0xff] }
   0x6   :  { %587 = vmatprep.subr.bf16.mxu0 %v586_v4  ;;  %594 = vmatprep.subr.bf16.mxu1 %v586_v4 }
   0x7   :  { %589 = vmatpush3.bf16.msra.mxu0 %v586_v4  ;;  %596 = vmatpush3.bf16.msra.mxu1 %v586_v4 }
   0x8   :  { %591 = vmatprep.subr.bf16.mxu0 %v590_v7  ;;  %595 = vmatprep.subr.bf16.mxu1 %v590_v7 }
   0x9   :  { %574 = vmatprep.mubr.msk.f32.mxu1 %vm50_vm0, %v31_v8 }
   0xa   :  { %12 = vsyncpa [#allocation4], 0  ;;  %v24_v9 = vld [vmem:[%s855_s0 + $0x8] sm:$0xff]  ;;  %v25_v11 = vld [vmem:[%s855_s0 + $0x10] sm:$0xff]  ;;  %v626_v23 = vmov 0  }
   0xb   :  { %593 = vmatpush3.bf16.msra.mxu0 %v590_v7  ;;  %597 = vmatpush3.bf16.msra.mxu1 %v590_v7  ;;  %v32_v10 = vld [vmem:[%s855_s0 + $0x48] sm:$0xff]  ;;  %v33_v12 = vld [vmem:[%s855_s0 + $0x50] sm:$0xff]  ;;  %v26_v13 = vld [vmem:[%s855_s0 + $0x18] sm:$0xff] }
   0xc   :  { %v34_v14 = vld [vmem:[%s855_s0 + $0x58] sm:$0xff]  ;;  %v27_v15 = vld [vmem:[%s855_s0 + $0x20] sm:$0xff]  ;;  %v28_v17 = vld [vmem:[%s855_s0 + $0x28] sm:$0xff]  ;;  %600 = vset.pattern.permute.xlu1 %v626_v23  ;;  %601 = vset.pattern.permute.xlu0 %v626_v23 }
   0xd   :  { %v35_v16 = vld [vmem:[%s855_s0 + $0x60] sm:$0xff]  ;;  %v36_v18 = vld [vmem:[%s855_s0 + $0x68] sm:$0xff]  ;;  %v29_v19 = vld [vmem:[%s855_s0 + $0x30] sm:$0xff] }
   0xe   :  { %563 = vmatmul.mubr.msk.f32.vlgmr.msra.gmra.mrb[0].mxu0 %vm50_vm0, %v24_v9  ;;  %575 = vmatmul.mubr.msk.f32.vlgmr.msra.gmra.mrb[0].mxu1 %vm50_vm0, %v32_v10  ;;  %v37_v20 = vld [vmem:[%s855_s0 + $0x70] sm:$0xff]  ;;  %v30_v21 = vld [vmem:[%s855_s0 + $0x38] sm:$0xff]  ;;  %v740_v24 = vld [vmem:[%s857_s2] ss:$0 sm:$0xff]  ;;  %s627_s2 = smov [#allocation3]  }
   0xf   :  { %565 = vmatprep.mubr.msk.f32.mxu0 %vm50_vm0, %v25_v11  ;;  %577 = vmatprep.mubr.msk.f32.mxu1 %vm50_vm0, %v33_v12  ;;  %v38_v22 = vld [vmem:[%s855_s0 + $0x78] sm:$0xff]  ;;  %v748_v33 = vld [vmem:[%s858_s3] ss:$0 sm:$0xff]  ;;  %s508_s3 = sshll.u32 %s627_s2, 4  ;;  %s509_s3 = int_to_ptr.vmem [resolvable:$true] %s508_s3 }
  0x10   :  { %s602_s9 = scalar_lea.vmem %s509_s3, 16  ;;  %s606_s10 = scalar_lea.vmem %s509_s3, 32 }
  0x11   :  { %p603_p0 = scmp.ne.s32.totalorder %s509_s3, %s602_s9  ;;  %p607_p1 = scmp.lt.s32.totalorder %s509_s3, %s509_s3 }
  0x12   :  { %566 = vmatmul.mubr.msk.f32.gmra.mrb[2].mxu0 %vm50_vm0, %v26_v13  ;;  %578 = vmatmul.mubr.msk.f32.gmra.mrb[2].mxu1 %vm50_vm0, %v34_v14  ;;  %p608_p2 = scmp.lt.s32.totalorder %s606_s10, %s602_s9 }
  0x13   :  { %568 = vmatprep.mubr.msk.f32.mxu0 %vm50_vm0, %v27_v15  ;;  %580 = vmatprep.mubr.msk.f32.mxu1 %vm50_vm0, %v35_v16 }
  0x14   :  { %p609_p3 = por %p608_p2, %p607_p1 }
  0x16   :  { %569 = vmatmul.mubr.msk.f32.gmra.mrb[4].mxu0 %vm50_vm0, %v28_v17  ;;  %581 = vmatmul.mubr.msk.f32.gmra.mrb[4].mxu1 %vm50_vm0, %v36_v18  ;;  %p610_p4 = pnand %p609_p3, %p603_p0 }
  0x17   :  { %571 = vmatprep.mubr.msk.f32.mxu0 %vm50_vm0, %v29_v19  ;;  %583 = vmatprep.mubr.msk.f32.mxu1 %vm50_vm0, %v37_v20 }
  0x1a   :  { %572 = vmatmul.mubr.msk.f32.gmra.mrb[6].mxu0 %vm50_vm0, %v30_v21  ;;  %584 = vmatmul.mubr.msk.f32.gmra.mrb[6].mxu1 %vm50_vm0, %v38_v22 }
  0xe1   :  { %v564_v25 = vpop.f32.mrb[0].mxu0  ;;  %v576_v26 = vpop.f32.mrb[0].mxu1 }
  0xe2   :  { %v171_v27 = vadd.f32 %v564_v25, %v740_v24  ;;  %v165_v28 = vpop.f32.mrb[1].mxu0  ;;  %v205_v29 = vpop.f32.mrb[1].mxu1  ;;  %v211_v36 = vadd.f32 %v576_v26, %v740_v24 }
  0xe3   :  { %v166_v30 = vadd.f32 %v740_v24, %v165_v28  ;;  %v206_v31 = vadd.f32 %v740_v24, %v205_v29 }
  0xe4   :  { %v261_v32 = vmul.f32 0.01, %v171_v27  ;;  %vm245_vm1 = vcmp.gt.f32.partialorder %v171_v27, 0.0  ;;  %v269_v49 = vmul.f32 0.01, %v211_v36  ;;  %vm253_vm6 = vcmp.gt.f32.partialorder %v211_v36, 0.0 }
  0xe5   :  { %v260_v34 = vmul.f32 0.01, %v166_v30  ;;  %v567_v35 = vpop.f32.mrb[2].mxu0  ;;  %vm244_vm2 = vcmp.gt.f32.partialorder %v166_v30, 0.0  ;;  %v268_v39 = vmul.f32 0.01, %v206_v31 }
  0xe6   :  { %v181_v37 = vadd.f32 %v567_v35, %v740_v24  ;;  %v175_v38 = vpop.f32.mrb[3].mxu0  ;;  %v277_v40 = vsel %vm245_vm1, %v171_v27, %v261_v32  ;;  %v579_v41 = vpop.f32.mrb[2].mxu1  ;;  %vm252_vm3 = vcmp.gt.f32.partialorder %v206_v31, 0.0  ;;  %v285_v2 = vsel %vm253_vm6, %v211_v36, %v269_v49 }
  0xe7   :  { %v176_v42 = vadd.f32 %v740_v24, %v175_v38  ;;  %v300_v43 = vmul.f32 %v748_v33, %v277_v40  ;;  %v221_v44 = vadd.f32 %v579_v41, %v740_v24  ;;  %v215_v45 = vpop.f32.mrb[3].mxu1  ;;  %v276_v47 = vsel %vm244_vm2, %v166_v30, %v260_v34  ;;  %v347_v34 = vld [vmem:[#allocation2] sm:$0x1] }
  0xe8   :  { %v263_v46 = vmul.f32 0.01, %v181_v37  ;;  %vm247_vm4 = vcmp.gt.f32.partialorder %v181_v37, 0.0  ;;  %v216_v54 = vadd.f32 %v740_v24, %v215_v45  ;;  %v284_v55 = vsel %vm252_vm3, %v206_v31, %v268_v39 }
  0xe9   :  { %v262_v48 = vmul.f32 0.01, %v176_v42  ;;  %317 = vadd.xlane.f32.xlu0 %v300_v43  ;;  %v570_v50 = vpop.f32.mrb[4].mxu0  ;;  %vm246_vm5 = vcmp.gt.f32.partialorder %v176_v42, 0.0  ;;  %v582_v56 = vpop.f32.mrb[4].mxu1  ;;  %v299_v58 = vmul.f32 %v748_v33, %v276_v47  ;;  %v307_v62 = vmul.f32 %v748_v33, %v284_v55 }
  0xea   :  { %v191_v51 = vadd.f32 %v570_v50, %v740_v24  ;;  %v185_v52 = vpop.f32.mrb[5].mxu0  ;;  %v279_v53 = vsel %vm247_vm4, %v181_v37, %v263_v46  ;;  %v225_v59 = vpop.f32.mrb[5].mxu1  ;;  %v270_v1 = vmul.f32 0.01, %v216_v54  ;;  %vm254_vm8 = vcmp.gt.f32.partialorder %v216_v54, 0.0 }
  0xeb   :  { %v302_v57 = vmul.f32 %v748_v33, %v279_v53  ;;  %v278_v61 = vsel %vm246_vm5, %v176_v42, %v262_v48  ;;  %v186_v6 = vadd.f32 %v740_v24, %v185_v52  ;;  %v308_v8 = vmul.f32 %v748_v33, %v285_v2 }
  0xec   :  { %v265_v60 = vmul.f32 0.01, %v191_v51  ;;  %vm249_vm7 = vcmp.gt.f32.partialorder %v191_v51, 0.0  ;;  %v301_v5 = vmul.f32 %v748_v33, %v278_v61  ;;  %v271_v9 = vmul.f32 0.01, %v221_v44 }
  0xed   :  { %321 = vadd.xlane.f32.xlu1 %v302_v57  ;;  %315 = vadd.xlane.f32.xlu0 %v299_v58  ;;  %v573_v63 = vpop.f32.mrb[6].mxu0  ;;  %v585_v0 = vpop.f32.mrb[6].mxu1  ;;  %v226_v10 = vadd.f32 %v740_v24, %v225_v59  ;;  %v286_v11 = vsel %vm254_vm8, %v216_v54, %v270_v1  ;;  %v264_v13 = vmul.f32 0.01, %v186_v6  ;;  %vm248_vm9 = vcmp.gt.f32.partialorder %v186_v6, 0.0 }
  0xee   :  { %v195_v3 = vpop.f32.mrb[7].mxu0  ;;  %v235_v4 = vpop.f32.mrb[7].mxu1  ;;  %v281_v7 = vsel %vm249_vm7, %v191_v51, %v265_v60  ;;  %v309_v14 = vmul.f32 %v748_v33, %v286_v11  ;;  %vm255_vm10 = vcmp.gt.f32.partialorder %v221_v44, 0.0  ;;  %v201_v16 = vadd.f32 %v573_v63, %v740_v24 }
  0xef   :  { %v304_v12 = vmul.f32 %v748_v33, %v281_v7  ;;  %v272_v15 = vmul.f32 0.01, %v226_v10  ;;  %v287_v17 = vsel %vm255_vm10, %v221_v44, %v271_v9  ;;  %vm256_vm11 = vcmp.gt.f32.partialorder %v226_v10, 0.0 }
  0xf0   :  { %v310_v18 = vmul.f32 %v748_v33, %v287_v17  ;;  %v280_v19 = vsel %vm248_vm9, %v186_v6, %v264_v13  ;;  %v267_v20 = vmul.f32 0.01, %v201_v16  ;;  %v196_v21 = vadd.f32 %v740_v24, %v195_v3 }
  0xf1   :  { %319 = vadd.xlane.f32.xlu1 %v301_v5  ;;  %331 = vadd.xlane.f32.xlu0 %v307_v62  ;;  %v288_v22 = vsel %vm256_vm11, %v226_v10, %v272_v15  ;;  %v303_v23 = vmul.f32 %v748_v33, %v280_v19  ;;  %vm251_vm12 = vcmp.gt.f32.partialorder %v201_v16, 0.0  ;;  %v231_v26 = vadd.f32 %v582_v56, %v740_v24 }
  0xf2   :  { %v311_v25 = vmul.f32 %v748_v33, %v288_v22  ;;  %v266_v27 = vmul.f32 0.01, %v196_v21  ;;  %v283_v28 = vsel %vm251_vm12, %v201_v16, %v267_v20  ;;  %vm250_vm13 = vcmp.gt.f32.partialorder %v196_v21, 0.0 }
  0xf3   :  { %v306_v29 = vmul.f32 %v748_v33, %v283_v28  ;;  %v273_v30 = vmul.f32 0.01, %v231_v26  ;;  %v236_v31 = vadd.f32 %v740_v24, %v235_v4  ;;  %vm257_vm14 = vcmp.gt.f32.partialorder %v231_v26, 0.0 }
  0xf4   :  { %v282_v32 = vsel %vm250_vm13, %v196_v21, %v266_v27  ;;  %v241_v36 = vadd.f32 %v585_v0, %v740_v24  ;;  %v353_v50 = vlaneseq  ;;  %vm400_vm1 = vcmask 130112  }
  0xf5   :  { %325 = vadd.xlane.f32.xlu1 %v304_v12  ;;  %333 = vadd.xlane.f32.xlu0 %v308_v8  ;;  %v305_v35 = vmul.f32 %v748_v33, %v282_v32  ;;  %v274_v37 = vmul.f32 0.01, %v236_v31  ;;  %v289_v38 = vsel %vm257_vm14, %v231_v26, %v273_v30  ;;  %vm258_vm15 = vcmp.gt.f32.partialorder %v236_v31, 0.0 }
  0xf6   :  { %v312_v39 = vmul.f32 %v748_v33, %v289_v38  ;;  %v275_v40 = vmul.f32 0.01, %v241_v36  ;;  %vm259_vm0 = vcmp.gt.f32.partialorder %v241_v36, 0.0  ;;  %v783_v53 = vshrl.u32 %v353_v50, 7 }
  0xf7   :  { %v290_v41 = vsel %vm258_vm15, %v236_v31, %v274_v37  ;;  %v786_v55 = vand.u32 127, %v353_v50  ;;  %vm407_vm2 = vcmask 195712   ;;  %vm414_vm3 = vcmask 261312  }
  0xf8   :  { %v313_v42 = vmul.f32 %v748_v33, %v290_v41  ;;  %v291_v43 = vsel %vm259_vm0, %v241_v36, %v275_v40  ;;  %v355_v54 = vsub.s32 0, %v783_v53  ;;  %vm421_vm4 = vcmask 326912  }
  0xf9   :  { %335 = vadd.xlane.f32.xlu0 %v309_v14  ;;  %v314_v44 = vmul.f32 %v748_v33, %v291_v43  ;;  %v395_v58 = vadd.s32 4294967288, %v786_v55  ;;  %v402_v60 = vadd.s32 4294967280, %v786_v55  ;;  %v393_v63 = vsub.s32 %v786_v55, %v783_v53 }
  0xfa   :  { %v409_v5 = vadd.s32 4294967272, %v786_v55  ;;  %v416_v7 = vadd.s32 4294967264, %v786_v55  ;;  %v423_v14 = vadd.s32 4294967256, %v786_v55  ;;  %v430_v15 = vadd.s32 4294967248, %v786_v55 }
  0xfb   :  { %v398_v0 = vsub.s32 %v395_v58, %v783_v53  ;;  %v405_v2 = vsub.s32 %v402_v60, %v783_v53  ;;  %vm428_vm5 = vcmask 392512   ;;  %v444_v28 = vadd.s32 4294967232, %v786_v55 }
  0xfc   :  { %v412_v11 = vsub.s32 %v409_v5, %v783_v53  ;;  %v419_v12 = vsub.s32 %v416_v7, %v783_v53  ;;  %v426_v20 = vsub.s32 %v423_v14, %v783_v53  ;;  %v433_v21 = vsub.s32 %v430_v15, %v783_v53 }
  0xfd   :  { %323 = vadd.xlane.f32.xlu0 %v303_v23  ;;  %vm435_vm6 = vcmask 458112   ;;  %vm442_vm7 = vcmask 523712   ;;  %v447_v38 = vsub.s32 %v444_v28, %v783_v53  ;;  %v458_v40 = vadd.s32 4294967216, %v786_v55 }
  0xfe   :  { %vm449_vm8 = vcmask 589312   ;;  %vm456_vm9 = vcmask 654912   ;;  %vm463_vm10 = vcmask 720512   ;;  %vm470_vm11 = vcmask 786112  }
  0xff   :  { %v461_v50 = vsub.s32 %v458_v40, %v783_v53  ;;  %vm477_vm12 = vcmask 851712   ;;  %vm484_vm13 = vcmask 917312   ;;  %vm491_vm14 = vcmask 982912  }
 0x100   :  { %vm498_vm15 = vcmask 1048512  }
 0x101   :  { %339 = vadd.xlane.f32.xlu0 %v311_v25  ;;  %v437_v25 = vadd.s32 4294967240, %v786_v55 }
 0x103   :  { %v440_v31 = vsub.s32 %v437_v25, %v783_v53 }
 0x105   :  { %329 = vadd.xlane.f32.xlu0 %v306_v29 }
 0x106   :  { %350 = vperm.xlu1 %600, %v347_v34  }
 0x109   :  { %327 = vadd.xlane.f32.xlu0 %v305_v35  ;;  %v451_v35 = vadd.s32 4294967224, %v786_v55 }
 0x10b   :  { %v454_v43 = vsub.s32 %v451_v35, %v783_v53 }
 0x10d   :  { %341 = vadd.xlane.f32.xlu0 %v312_v39 }
 0x111   :  { %343 = vadd.xlane.f32.xlu0 %v313_v42 }
 0x115   :  { %345 = vadd.xlane.f32.xlu0 %v314_v44 }
 0x12a   :  { %337 = vadd.xlane.f32.xlu1 %v310_v18 }
 0x176   :  { %v318_v45 = vpop.xlane.xlu0 %317 }
 0x17a   :  { %v316_v24 = vpop.xlane.xlu0 %315  ;;  %v322_v47 = vpop.xlane.xlu1 %321 }
 0x17e   :  { %v332_v46 = vpop.xlane.xlu0 %331  ;;  %v320_v49 = vpop.xlane.xlu1 %319 }
 0x182   :  { %v779_v48 = vpop.xlane.xlu0 %333  ;;  %v326_v52 = vpop.xlane.xlu1 %325 }
 0x186   :  { %v781_v51 = vpop.xlane.xlu0 %335  ;;  %v351_v56 = vpop.permute.xlu1 %350 }
 0x187   :  { %v788_v57 = vrot.slane %v351_v56, %v355_v54  ;;  %v493_v56 = vadd.s32 4294967176, %v786_v55 }
 0x189   :  { %v357_v61 = vadd.f32 %v788_v57, %v316_v24  ;;  %v358_v62 = vadd.f32 %v788_v57, %v318_v45  ;;  %v359_v1 = vadd.f32 %v788_v57, %v320_v49  ;;  %v360_v9 = vadd.f32 %v788_v57, %v322_v47 }
 0x18a   :  { %v324_v33 = vpop.xlane.xlu0 %323  ;;  %v362_v26 = vadd.f32 %v788_v57, %v326_v52  ;;  %v365_v37 = vadd.f32 %v788_v57, %v332_v46  ;;  %v465_v45 = vadd.s32 4294967208, %v786_v55  ;;  %v366_v24 = vadd.f32 %v788_v57, %v779_v48 }
 0x18b   :  { %v394_v3 = vrot.slane %v357_v61, %v393_v63  ;;  %v399_v4 = vrot.slane %v358_v62, %v398_v0  ;;  %v406_v8 = vrot.slane %v359_v1, %v405_v2  ;;  %v361_v13 = vadd.f32 %v788_v57, %v324_v33 }
 0x18c   :  { %v413_v18 = vrot.slane %v360_v9, %v412_v11  ;;  %v427_v34 = vrot.slane %v362_v26, %v426_v20  ;;  %v472_v47 = vadd.s32 4294967200, %v786_v55  ;;  %v448_v46 = vrot.slane %v365_v37, %v447_v38 }
 0x18d   :  { %v401_v10 = vsel %vm400_vm1, %v399_v4, %v394_v3  ;;  %v420_v19 = vrot.slane %v361_v13, %v419_v12  ;;  %v479_v49 = vadd.s32 4294967192, %v786_v55  ;;  %v367_v52 = vadd.f32 %v788_v57, %v781_v51 }
 0x18e   :  { %v791_v59 = vpop.xlane.xlu0 %339  ;;  %v408_v17 = vsel %vm407_vm2, %v406_v8, %v401_v10  ;;  %v486_v33 = vadd.s32 4294967184, %v786_v55  ;;  %v468_v58 = vsub.s32 %v465_v45, %v783_v53  ;;  %v455_v60 = vrot.slane %v366_v24, %v454_v43 }
 0x18f   :  { %v415_v23 = vsel %vm414_vm3, %v413_v18, %v408_v17  ;;  %v475_v48 = vsub.s32 %v472_v47, %v783_v53  ;;  %v369_v61 = vadd.f32 %v788_v57, %v791_v59  ;;  %v482_v62 = vsub.s32 %v479_v49, %v783_v53 }
 0x190   :  { %v422_v27 = vsel %vm421_vm4, %v420_v19, %v415_v23  ;;  %v462_v3 = vrot.slane %v367_v52, %v461_v50  ;;  %v489_v55 = vsub.s32 %v486_v33, %v783_v53  ;;  %v496_v5 = vsub.s32 %v493_v56, %v783_v53 }
 0x191   :  { %v429_v36 = vsel %vm428_vm5, %v427_v34, %v422_v27  ;;  %v476_v7 = vrot.slane %v369_v61, %v475_v48 }
 0x192   :  { %v330_v6 = vpop.xlane.xlu0 %329 }
 0x193   :  { %v364_v32 = vadd.f32 %v788_v57, %v330_v6 }
 0x195   :  { %v441_v41 = vrot.slane %v364_v32, %v440_v31 }
 0x196   :  { %v328_v16 = vpop.xlane.xlu0 %327 }
 0x197   :  { %v363_v22 = vadd.f32 %v788_v57, %v328_v16 }
 0x199   :  { %v434_v29 = vrot.slane %v363_v22, %v433_v21 }
 0x19a   :  { %v342_v30 = vpop.xlane.xlu0 %341 }
 0x19b   :  { %v436_v39 = vsel %vm435_vm6, %v434_v29, %v429_v36  ;;  %v370_v51 = vadd.f32 %v788_v57, %v342_v30 }
 0x19c   :  { %v443_v44 = vsel %vm442_vm7, %v441_v41, %v436_v39 }
 0x19d   :  { %v450_v54 = vsel %vm449_vm8, %v448_v46, %v443_v44  ;;  %v483_v9 = vrot.slane %v370_v51, %v482_v62 }
 0x19e   :  { %v344_v42 = vpop.xlane.xlu0 %343  ;;  %v457_v2 = vsel %vm456_vm9, %v455_v60, %v450_v54 }
 0x19f   :  { %v371_v4 = vadd.f32 %v788_v57, %v344_v42  ;;  %v464_v8 = vsel %vm463_vm10, %v462_v3, %v457_v2 }
 0x1a1   :  { %v490_v11 = vrot.slane %v371_v4, %v489_v55 }
 0x1a2   :  { %v346_v63 = vpop.xlane.xlu0 %345 }
 0x1a3   :  { %v372_v59 = vadd.f32 %v788_v57, %v346_v63 }
 0x1a5   :  { %v497_v13 = vrot.slane %v372_v59, %v496_v5 }
 0x1b7   :  { %v338_v0 = vpop.xlane.xlu1 %337 }
 0x1b8   :  { %v368_v1 = vadd.f32 %v788_v57, %v338_v0 }
 0x1ba   :  { %v469_v6 = vrot.slane %v368_v1, %v468_v58 }
 0x1bc   :  { %v471_v10 = vsel %vm470_vm11, %v469_v6, %v464_v8 }
 0x1bd   :  { %v478_v12 = vsel %vm477_vm12, %v476_v7, %v471_v10 }
 0x1be   :  { %v485_v14 = vsel %vm484_vm13, %v483_v9, %v478_v12 }
 0x1bf   :  { %v492_v15 = vsel %vm491_vm14, %v490_v11, %v485_v14 }
 0x1c0   :  { %v499_v53 = vsel %vm498_vm15, %v497_v13, %v492_v15 }
 0x1c1   :  { %501 = vst [vmem:[#allocation3] sm:$0x1] %v499_v53 }
 0x1c2   :  { %613 = shalt.err (!%p610_p4)
}
 0x1c3   :  { %s614_s13 = scalar_lea.hbm %s860_s5, 16 }
 0x1c4   :  { %p615_p5 = scmp.ne.s32.totalorder %s860_s5, %s614_s13  ;;  %p618_p6 = scmp.lt.u32.totalorder %s614_s13, %s860_s5 }
 0x1c6   :  { %p620_p7 = pnand %p618_p6, %p615_p5 }
 0x1c8   :  { %623 = shalt.err (!%p620_p7)
}
 0x1c9   :  { %511 = dma.vmem_to_hbm [thread:$0]  %s509_s3, 16, %s860_s5, [#allocation4]  }
 0x1ca   :  { %624 = dma.done.wait [#allocation4], 16  }
 0x1cb   :  { %625 = vsyncadd [#allocation4], 4294967280 }
 0x1cc   :  { %515 = vsyncpa [#allocation4], 1 }

</bundles_post_ra>
